<compile_context>
chip_gen: v6e
topology: v6e:2x2x1
jax: 0.10.0
libtpu: 0.0.40
codegen_flags: <defaults>
</compile_context>

<pallas_src>
import functools
import math

import jax
import jax.numpy as jnp
from jax import lax
from jax.experimental import pallas as pl
from jax.experimental.pallas import tpu as pltpu


def _non_uniform_penalty_kernel(logits_ref, partial_ref, *, b_total, tile_rows,
                                needs_mask):
    """Accumulates sum_over_rows(softmax(logits_row)) into a (1, 1, C) partial."""
    j = pl.program_id(1)

    @pl.when(j == 0)
    def _init():
        partial_ref[...] = jnp.zeros_like(partial_ref)

    x = logits_ref[...].astype(jnp.float32)                  # (TB, C), cast in-kernel

    # Row-wise numerically stable softmax over dim=1; intermediates stay 2-D.
    x_max = jnp.max(x, axis=1, keepdims=True)
    e = jnp.exp(x - x_max)
    denom = jnp.sum(e, axis=1, keepdims=True)
    r = pl.reciprocal(denom, approx=True)                    # EUP slot
    r = r * (2.0 - denom * r)                                # one Newton step -> ~f32 exact
    probs = e * r                                            # (TB, C)

    if needs_mask:
        # Only emitted when grid padding can exist; (TB, 1) iota + one select.
        g = pl.program_id(0) * pl.num_programs(1) + j        # global tile index
        row = g * tile_rows + lax.broadcasted_iota(jnp.int32, (tile_rows, 1), 0)
        probs = jnp.where(row < b_total, probs, 0.0)

    partial_ref[...] += jnp.sum(probs, axis=0, keepdims=True)[None]   # (1, 1, C)


def _vmem_budget_bytes():
    """(working-set budget, vmem_limit_bytes) derived from the chip's VMEM size."""
    cap = None
    try:
        info = pltpu.get_tpu_info()
        cap = int(getattr(info, "vmem_capacity_bytes", 0)) or None
    except Exception:  # pragma: no cover - conservative fallback off-TPU / old jax
        cap = None
    if cap is None:
        # Safe on every generation (v7x has only 64 MiB physical VMEM).
        return 40 << 20, 56 << 20
    budget = min(int(cap * 0.6), 96 << 20)        # ~38 MiB on v7x, ~77 MiB on v5e/v6e
    limit = max(budget, min(budget + (16 << 20), cap - (8 << 20)))
    return budget, limit


def _choose_tile_rows(b, c, itemsize, budget_bytes):
    """Largest sublane-aligned batch tile whose working set fits the VMEM budget."""
    align = {4: 8, 2: 16, 1: 32}.get(itemsize, 8)         # sublane packing per dtype
    # Per row: 2x double-buffered input + ~3 live (TB, C) f32 temps.
    per_row_bytes = c * (2 * itemsize + 3 * 4)
    tb = budget_bytes // max(per_row_bytes, 1)
    tb = min(tb, (8 << 20) // max(4 * c, 1))              # cap each f32 temp at ~8 MiB
    if tb >= b:
        return b                                          # whole batch genuinely fits
    return max(align, (tb // align) * align)


def non_uniform_penalty(logits, targets=None, *, tile_rows=None):
    """JAX/Pallas equivalent of NonUniformPenalty.forward. `targets` is unused."""
    del targets
    b, c = logits.shape
    itemsize = jnp.dtype(logits.dtype).itemsize
    budget, vmem_limit = _vmem_budget_bytes()

    tb = tile_rows if tile_rows is not None else _choose_tile_rows(b, c, itemsize, budget)
    tb = max(1, min(int(tb), b))

    n_tiles = pl.cdiv(b, tb)
    n_chunks = 2 if n_tiles >= 2 else 1                   # megacore split on v7x, no-op elsewhere
    tpc = pl.cdiv(n_tiles, n_chunks)                      # tiles per chunk
    needs_mask = (n_chunks * tpc * tb) > b                # static: any padded rows at all?
    last_tile = n_tiles - 1

    cost = pl.CostEstimate(
        flops=6 * b * c,
        transcendentals=b * c + b,
        bytes_accessed=b * c * itemsize + n_chunks * c * 4,
    )

    kernel = functools.partial(
        _non_uniform_penalty_kernel,
        b_total=b, tile_rows=tb, needs_mask=needs_mask,
    )

    partials = pl.pallas_call(
        kernel,
        out_shape=jax.ShapeDtypeStruct((n_chunks, 1, c), jnp.float32),
        grid_spec=pltpu.PrefetchScalarGridSpec(
            num_scalar_prefetch=0,
            grid=(n_chunks, tpc),
            in_specs=[pl.BlockSpec(
                (tb, c),
                # Clamp trailing (padded) tiles to the last real tile; their rows
                # are masked out in-kernel.
                lambda i, j: (jnp.minimum(i * tpc + j, last_tile), 0))],
            out_specs=pl.BlockSpec((1, 1, c), lambda i, j: (i, 0, 0)),
        ),
        compiler_params=pltpu.CompilerParams(
            dimension_semantics=("parallel", "arbitrary"),
            vmem_limit_bytes=int(vmem_limit),
        ),
        cost_estimate=cost,
    )(logits)

    # Tiny finalize epilogue:  KL(prior || mean) = -log(C) - (1/C) * sum(log(mean_c)).
    pred_mean = jnp.sum(partials, axis=(0, 1)) * jnp.float32(1.0 / b)      # (C,)
    penalty = jnp.float32(-math.log(c)) - jnp.sum(jnp.log(pred_mean)) * jnp.float32(1.0 / c)
    return penalty


def _reference(logits):
    # Pure-JAX reference for a sanity check.
    c = logits.shape[1]
    prior = jnp.ones((c,), jnp.float32) / c
    pred_mean = jax.nn.softmax(logits.astype(jnp.float32), axis=1).mean(0)
    return jnp.sum(prior * jnp.log(prior / pred_mean))


if __name__ == "__main__":
    key = jax.random.PRNGKey(0)
    k1, k2, k3 = jax.random.split(key, 3)

    # 1) Small f32 case, auto tiling -> single tile, no masking.
    B, C = 8, 4
    logits = jax.random.normal(k1, (B, C), dtype=jnp.float32)
    targets = jax.random.randint(k2, (B,), 0, C)          # unused, mirrors torch signature
    out = jax.block_until_ready(non_uniform_penalty(logits, targets))
    ref = _reference(logits)
    assert jnp.allclose(out, ref, atol=1e-5, rtol=1e-5), (out, ref)

    # 2) Ragged f32: grid (2, 2) with clamped trailing tile + row mask.
    B2, C2 = 20, 4
    logits2 = jax.random.normal(k3, (B2, C2), dtype=jnp.float32)
    out2 = jax.block_until_ready(non_uniform_penalty(logits2, None, tile_rows=8))
    ref2 = _reference(logits2)
    assert jnp.allclose(out2, ref2, atol=1e-5, rtol=1e-5), (out2, ref2)

    # 3) bf16 multi-tile path (16-row sublane-aligned tiles), ragged + clamp.
    B3, C3 = 40, 4
    logits3 = jax.random.normal(jax.random.PRNGKey(1), (B3, C3), dtype=jnp.bfloat16)
    out3 = jax.block_until_ready(non_uniform_penalty(logits3, None, tile_rows=16))
    ref3 = _reference(logits3)
    assert jnp.allclose(out3, ref3, atol=1e-3, rtol=1e-3), (out3, ref3)

    print("KERNEL_OK")
</pallas_src>

<mosaic_0001>
module attributes {stable_mosaic.version = 11 : i64} {
  func.func @_non_uniform_penalty_kernel(%arg0: i32, %arg1: i32, %arg2: memref<8x4xf32, #tpu.memory_space<vmem>>, %arg3: memref<1x1x4xf32, #tpu.memory_space<vmem>>) attributes {dimension_semantics = [#tpu.dimension_semantics<parallel>, #tpu.dimension_semantics<arbitrary>], iteration_bounds = array<i64: 1, 1>, scalar_prefetch = 0 : i64, scratch_operands = 0 : i64, tpu.core_type = #tpu.core_type<tc>, window_params = [{transform_indices = @transform_0, window_bounds = array<i64: 8, 4>}, {transform_indices = @transform_1, window_bounds = array<i64: 1, 1, 4>}]} {
    %c0_i32 = arith.constant 0 : i32
    %0 = arith.cmpi eq, %arg1, %c0_i32 : i32
    %1 = arith.extui %0 : i1 to i32
    %c0_i32_0 = arith.constant 0 : i32
    %2 = arith.cmpi ne, %1, %c0_i32_0 : i32
    scf.if %2 {
      %cst_11 = arith.constant 0.000000e+00 : f32
      %24 = vector.broadcast %cst_11 : f32 to vector<1x1x4xf32>
      %c0_12 = arith.constant 0 : index
      %c0_13 = arith.constant 0 : index
      %c0_14 = arith.constant 0 : index
      %25 = vector.load %arg3[%c0_12, %c0_13, %c0_14] : memref<1x1x4xf32, #tpu.memory_space<vmem>>, vector<1x1x4xf32>
      tpu.vector_store %arg3[%c0_12, %c0_13, %c0_14], %24 {strides = array<i32>} : memref<1x1x4xf32, #tpu.memory_space<vmem>>, vector<1x1x4xf32>,
    } else {
    }
    %c0 = arith.constant 0 : index
    %c0_1 = arith.constant 0 : index
    %3 = vector.load %arg2[%c0, %c0_1] : memref<8x4xf32, #tpu.memory_space<vmem>>, vector<8x4xf32>
    %cst = arith.constant dense<0xFF800000> : vector<8xf32>
    %4 = vector.multi_reduction <maximumf>, %3, %cst [1] : vector<8x4xf32> to vector<8xf32>
    %5 = vector.shape_cast %4 : vector<8xf32> to vector<8x1xf32>
    %6 = vector.broadcast %5 : vector<8x1xf32> to vector<8x4xf32>
    %7 = arith.subf %3, %6 : vector<8x4xf32>
    %8 = math.exp %7 : vector<8x4xf32>
    %cst_2 = arith.constant dense<0.000000e+00> : vector<8xf32>
    %9 = vector.multi_reduction <add>, %8, %cst_2 [1] : vector<8x4xf32> to vector<8xf32>
    %10 = vector.shape_cast %9 : vector<8xf32> to vector<8x1xf32>
    %11 = tpu.reciprocal %10 {approx = true} : vector<8x1xf32> -> vector<8x1xf32>
    %12 = arith.mulf %10, %11 : vector<8x1xf32>
    %cst_3 = arith.constant 2.000000e+00 : f32
    %13 = vector.broadcast %cst_3 : f32 to vector<8x1xf32>
    %14 = arith.subf %13, %12 : vector<8x1xf32>
    %15 = arith.mulf %11, %14 : vector<8x1xf32>
    %16 = vector.broadcast %15 : vector<8x1xf32> to vector<8x4xf32>
    %17 = arith.mulf %8, %16 : vector<8x4xf32>
    %c0_4 = arith.constant 0 : index
    %c0_5 = arith.constant 0 : index
    %c0_6 = arith.constant 0 : index
    %18 = vector.load %arg3[%c0_4, %c0_5, %c0_6] : memref<1x1x4xf32, #tpu.memory_space<vmem>>, vector<1x1x4xf32>
    %cst_7 = arith.constant dense<0.000000e+00> : vector<4xf32>
    %19 = vector.multi_reduction <add>, %17, %cst_7 [0] : vector<8x4xf32> to vector<4xf32>
    %20 = vector.shape_cast %19 : vector<4xf32> to vector<1x4xf32>
    %21 = vector.shape_cast %20 : vector<1x4xf32> to vector<1x1x4xf32>
    %22 = arith.addf %18, %21 : vector<1x1x4xf32>
    %c0_8 = arith.constant 0 : index
    %c0_9 = arith.constant 0 : index
    %c0_10 = arith.constant 0 : index
    %23 = vector.load %arg3[%c0_8, %c0_9, %c0_10] : memref<1x1x4xf32, #tpu.memory_space<vmem>>, vector<1x1x4xf32>
    tpu.vector_store %arg3[%c0_8, %c0_9, %c0_10], %22 {strides = array<i32>} : memref<1x1x4xf32, #tpu.memory_space<vmem>>, vector<1x1x4xf32>,
    return
  }
  func.func @transform_0(%arg0: i32, %arg1: i32) -> (i32, i32) {
    %c1_i32 = arith.constant 1 : i32
    %0 = arith.muli %arg0, %c1_i32 : i32
    %1 = arith.addi %0, %arg1 : i32
    %c0_i32 = arith.constant 0 : i32
    %2 = arith.minsi %1, %c0_i32 : i32
    %c0_i32_0 = arith.constant 0 : i32
    %c0_i32_1 = arith.constant 0 : i32
    return %2, %c0_i32_0 : i32, i32
  }
  func.func @transform_1(%arg0: i32, %arg1: i32) -> (i32, i32, i32) {
    %c0_i32 = arith.constant 0 : i32
    %c0_i32_0 = arith.constant 0 : i32
    %c0_i32_1 = arith.constant 0 : i32
    return %arg0, %c0_i32, %c0_i32_0 : i32, i32, i32
  }
}

</mosaic_0001>

<bundles_post_ra>
// kernel: tpu_custom_call.1
= control target key start
LH: loop header
LB: loop body
LE: loop exit
PB: predicated region body
PF: predicated region fallthrough
CT: control target
= control target key end

     0   :  { %vm43_vm0 = vcmask 31744   ;;  %s140_s0 = inlined_call_operand.vmem [shape: f32[8,4], index: 0, kind: input, shape index: {}]   ;;  %s141_s1 = inlined_call_operand.hbm [shape: f32[1,1,4], index: 1, kind: output, shape index: {}]  }
   0x1   :  { %v42_v0 = vld [vmem:[%s140_s0] sm:$0xff] }
   0x2   :  { %6 = vsyncpa [#allocation3], 0  ;;  %v44_v1 = vsel %vm43_vm0, %v42_v0, -inf  ;;  %vm40_vm1 = vcmask 24576   ;;  %v117_v7 = vmov 0.0   ;;  %s118_s0 = smov [#allocation2]  }
   0x3   :  { %45 = vmax.xlane.f32.xlu0 %v44_v1  ;;  %41 = vst.msk [vmem:[#allocation2] sm:$0x1] %vm40_vm1, %v117_v7  ;;  %s75_s8 = sshll.u32 %s118_s0, 4  ;;  %s76_s8 = int_to_ptr.vmem [resolvable:$true] %s75_s8 }
   0x4   :  { %s95_s9 = scalar_lea.vmem %s76_s8, 16  ;;  %s99_s10 = scalar_lea.vmem %s76_s8, 32 }
   0x5   :  { %p96_p0 = scmp.ne.s32.totalorder %s76_s8, %s95_s9  ;;  %p100_p1 = scmp.lt.s32.totalorder %s76_s8, %s76_s8 }
   0x6   :  { %p101_p2 = scmp.lt.s32.totalorder %s99_s10, %s95_s9 }
   0x8   :  { %p102_p3 = por %p101_p2, %p100_p1 }
   0xa   :  { %v58_v20 = vld [vmem:[#allocation2] sm:$0x1]  ;;  %p103_p4 = pnand %p102_p3, %p96_p0 }
  0x8c   :  { %v46_v2 = vpop.xlane.xlu0 %45 }
  0x8d   :  { %v47_v3 = vsub.f32 %v42_v0, %v46_v2 }
  0x8f   :  { %v48_v4 = vmul.f32 1.442695, %v47_v3 }
  0x91   :  { %91 = vpow2.f32 %v48_v4 }
  0x9e   :  { %v92_v5 = vpop.eup %91 }
  0x9f   :  { %v50_v6 = vsel %vm43_vm0, %v92_v5, 0.0 }
  0xa0   :  { %51 = vadd.xlane.f32.xlu0 %v50_v6 }
 0x129   :  { %v52_v8 = vpop.xlane.xlu0 %51 }
 0x12a   :  { %93 = vrcp.f32 %v52_v8 }
 0x137   :  { %v94_v9 = vpop.eup %93 }
 0x138   :  { %v54_v10 = vmul.f32 %v94_v9, %v52_v8 }
 0x13a   :  { %v55_v11 = vsub.f32 2.0, %v54_v10 }
 0x13c   :  { %v56_v12 = vmul.f32 %v94_v9, %v55_v11 }
 0x13e   :  { %v57_v13 = vmul.f32 %v92_v5, %v56_v12 }
 0x140   :  { %v59_v14 = vsel %vm43_vm0, %v57_v13, 0.0 }
 0x141   :  { %v60_v15 = vrot.slane %v59_v14, 4 }
 0x143   :  { %v61_v16 = vadd.f32 %v60_v15, %v59_v14 }
 0x145   :  { %v62_v17 = vrot.slane %v61_v16, 2 }
 0x147   :  { %v63_v18 = vadd.f32 %v62_v17, %v61_v16 }
 0x149   :  { %v64_v19 = vrot.slane %v63_v18, 1 }
 0x14b   :  { %v65_v21 = vadd.f32 %v64_v19, %v63_v18 }
 0x14d   :  { %v66_v22 = vadd.f32 %v65_v21, %v58_v20 }
 0x14f   :  { %68 = vst.msk [vmem:[#allocation2] sm:$0x1] %vm40_vm1, %v66_v22 }
 0x150   :  { %106 = shalt.err (!%p103_p4)
}
 0x151   :  { %78 = dma.vmem_to_hbm [thread:$0]  %s76_s8, 16, %s141_s1, [#allocation3]  }
 0x152   :  { %115 = dma.done.wait [#allocation3], 16  }
 0x153   :  { %116 = vsyncadd [#allocation3], 4294967280 }
 0x154   :  { %82 = vsyncpa [#allocation3], 1 }

</bundles_post_ra>
